<compile_context>
chip_gen: v7x
topology: tpu7x:2x2x1
jax: 0.10.0
libtpu: 0.0.40
codegen_flags: <defaults>
</compile_context>

<pallas_src>
import functools

import jax
import jax.numpy as jnp
from jax.experimental import pallas as pl
from jax.experimental.pallas import tpu as pltpu

_LN_EPS = 1e-5


def _round_up(v, m):
    return ((v + m - 1) // m) * m


def _pick_tm(M, target, row_align=128):
    """Largest row-tile <= target that divides M (prefer 128-multiples)."""
    target = max(8, int(target))
    if M <= target:
        return M                      # single full tile, no padding
    t = (target // row_align) * row_align
    while t >= row_align:
        if M % t == 0:
            return t
        t -= row_align
    t = (target // 8) * 8
    while t >= 8:
        if M % t == 0:
            return t
        t -= 8
    return max(8, (target // 8) * 8)  # padding fallback


def _pick_tk(D, target):
    """Largest K-tile <= target that is a multiple of 128 and divides D."""
    target = max(128, min(int(target), D))
    best, t = 128, 128
    while t <= target:
        if D % t == 0:
            best = t
        t += 128
    return best


@functools.lru_cache(maxsize=None)
def _vmem_capacity_bytes():
    try:
        return int(pltpu.get_tpu_info().vmem_capacity_bytes)
    except Exception:
        return 64 << 20   # conservative fallback (v7x per-TC VMEM)


@functools.lru_cache(maxsize=None)
def _buffered_one_supported():
    """One-time probe: is pipeline_mode=pl.Buffered(1) accepted by this jax?"""
    def _copy(x_ref, o_ref):
        o_ref[...] = x_ref[...]
    try:
        fn = pl.pallas_call(
            _copy,
            out_shape=jax.ShapeDtypeStruct((8, 128), jnp.float32),
            grid_spec=pltpu.PrefetchScalarGridSpec(
                num_scalar_prefetch=0,
                grid=(1,),
                in_specs=[pl.BlockSpec((8, 128), lambda i: (0, 0),
                                       pipeline_mode=pl.Buffered(1))],
                out_specs=pl.BlockSpec((8, 128), lambda i: (0, 0)),
            ),
        )
        jax.block_until_ready(fn(jnp.zeros((8, 128), jnp.float32)))
        return True
    except Exception:
        return False


def _resident_spec(shape, index_map, single_buffer):
    """BlockSpec for a grid-invariant operand (constant index_map)."""
    if single_buffer:
        return pl.BlockSpec(shape, index_map, pipeline_mode=pl.Buffered(1))
    return pl.BlockSpec(shape, index_map)


# --------------------------------------------------------------------------
# Kernels
# --------------------------------------------------------------------------

def _gated_mlp_resident_kernel(x_ref, w_ref, b_ref, ln_ref, o_ref):
    # x_ref : [tm, D]  native dtype     w_ref : [D, 2D] (f32 or bf16)
    # b_ref : [1, 2D]  f32              ln_ref: [2, D]  f32 (gamma; beta)
    D = o_ref.shape[-1]
    x = x_ref[...]

    # Single fused MXU pass, f32 accumulation. Cast LHS only for the dot.
    x_mm = x if x.dtype == w_ref.dtype else x.astype(w_ref.dtype)
    gates = jnp.dot(x_mm, w_ref[...],
                    preferred_element_type=jnp.float32) + b_ref[...]
    ga = gates[:, :D]
    gb = gates[:, D:]

    # GLU gating + residual in f32 (dropout is identity at inference).
    h = ga * jax.nn.sigmoid(gb) + x.astype(jnp.float32)

    # One-pass LN stats: the two lane reductions are independent XLU ops.
    inv_d = jnp.float32(1.0 / D)
    mean = jnp.sum(h, axis=-1, keepdims=True) * inv_d
    ex2 = jnp.sum(h * h, axis=-1, keepdims=True) * inv_d
    var = ex2 - mean * mean
    normed = (h - mean) * jax.lax.rsqrt(var + _LN_EPS)
    y = normed * ln_ref[0:1, :] + ln_ref[1:2, :]

    o_ref[...] = y.astype(o_ref.dtype)


def _gated_mlp_streamk_kernel(x_ref, w_ref, b_ref, ln_ref, o_ref,
                              acc_ref, x_save_ref):
    # Streaming-K path (weights too large to keep resident):
    # x_ref : [tm, tk]        w_ref : [tk, 2D]
    # acc_ref : VMEM [tm, 2D] f32,   x_save_ref : VMEM [tm, D] x-dtype
    D = o_ref.shape[-1]
    tk = x_ref.shape[-1]
    k = pl.program_id(1)

    @pl.when(k == 0)
    def _():
        acc_ref[...] = jnp.zeros_like(acc_ref)

    x = x_ref[...]
    off = pl.multiple_of(k * tk, tk)
    x_save_ref[:, pl.ds(off, tk)] = x           # stash chunk for residual/LN

    x_mm = x if x.dtype == w_ref.dtype else x.astype(w_ref.dtype)
    acc_ref[...] += jnp.dot(x_mm, w_ref[...],
                            preferred_element_type=jnp.float32)

    @pl.when(k == pl.num_programs(1) - 1)
    def _():
        gates = acc_ref[...] + b_ref[...]
        ga = gates[:, :D]
        gb = gates[:, D:]
        x_full = x_save_ref[...].astype(jnp.float32)
        h = ga * jax.nn.sigmoid(gb) + x_full
        inv_d = jnp.float32(1.0 / D)
        mean = jnp.sum(h, axis=-1, keepdims=True) * inv_d
        ex2 = jnp.sum(h * h, axis=-1, keepdims=True) * inv_d
        var = ex2 - mean * mean
        normed = (h - mean) * jax.lax.rsqrt(var + _LN_EPS)
        y = normed * ln_ref[0:1, :] + ln_ref[1:2, :]
        o_ref[...] = y.astype(o_ref.dtype)


# --------------------------------------------------------------------------
# Param prep + wrapper
# --------------------------------------------------------------------------

def prepare_gated_mlp_params(w_gate, b_gate, gamma, beta, *, mxu_dtype=None):
    """One-time (model-load) prep.

    w_gate: [2D, D] (PyTorch nn.Linear weight), b_gate: [2D], gamma/beta: [D].
    Returns:
      w_fused : [D, 2D]  = [W_a^T | W_b^T]   (optionally cast to mxu_dtype, e.g. bf16)
      b_fused : [1, 2D]  f32                 (= [b_a | b_b])
      ln      : [2, D]   f32                 (row 0 = gamma, row 1 = beta)
    """
    D = w_gate.shape[1]
    w_fused = jnp.concatenate(
        [jnp.asarray(w_gate[:D, :]).T, jnp.asarray(w_gate[D:, :]).T], axis=1)
    if mxu_dtype is not None:
        w_fused = w_fused.astype(mxu_dtype)
    b_fused = jnp.asarray(b_gate).astype(jnp.float32).reshape(1, 2 * D)
    ln = jnp.stack([jnp.asarray(gamma), jnp.asarray(beta)]).astype(jnp.float32)
    return w_fused, b_fused, ln


@functools.partial(jax.jit,
                   static_argnames=("tm", "tk", "max_resident_weight_bytes"))
def gated_mlp_block(x, w_fused, b_fused, ln_params, *,
                    tm=None, tk=None, max_resident_weight_bytes=None):
    """x: [B, S, D]; w_fused: [D, 2D]; b_fused: [1, 2D]; ln_params: [2, D]."""
    B, S, D = x.shape
    M = B * S
    x2d = x.reshape(M, D)

    x_itemsize = jnp.dtype(x.dtype).itemsize
    w_itemsize = jnp.dtype(w_fused.dtype).itemsize
    out_itemsize = x_itemsize

    cap = _vmem_capacity_bytes()
    vmem_budget = int(cap * 0.85)          # ~108 MiB v5e/v6e, ~54 MiB v7x

    w_bytes = D * (2 * D) * w_itemsize     # fused weight, single-buffered
    small_bytes = (2 * D) * 4 + 2 * D * 4  # fused bias + LN params (f32)

    can_stream = (D % 128 == 0)
    if max_resident_weight_bytes is None:
        max_resident_weight_bytes = vmem_budget // 2
    use_resident = (w_bytes <= max_resident_weight_bytes) or (not can_stream)

    single_buffer = _buffered_one_supported()

    # Per-row VMEM: double-buffered in/out tiles + f32 temps (gates, h, ...).
    per_row = 2 * D * x_itemsize + 2 * D * out_itemsize + 10 * D * 4

    if use_resident:
        avail = max(vmem_budget - w_bytes - small_bytes, 8 * per_row)
    else:
        if tk is None:
            slab_budget = vmem_budget // 3
            tk = _pick_tk(D, slab_budget // (2 * (2 * D) * w_itemsize))
        assert D % tk == 0 and tk % 128 == 0, "tk must divide D and be 128-aligned"
        w_stream_bytes = 2 * tk * (2 * D) * w_itemsize     # double-buffered slab
        # extra per-row: f32 accumulator + x stash
        per_row += (2 * D) * 4 + D * x_itemsize
        avail = max(vmem_budget - w_stream_bytes - small_bytes, 8 * per_row)

    tm_cap = max(8, avail // per_row)
    tm_target = min(2048 if x_itemsize <= 2 else 1024, int(tm_cap))
    if tm is None:
        tm = _pick_tm(M, tm_target)

    M_pad = _round_up(M, tm)
    if M_pad != M:
        # TODO(synk): handle the ragged last tile in-kernel (clamped index_map +
        # masked store) to avoid this extra HBM pass over x and the out[:M] slice.
        x2d = jnp.pad(x2d, ((0, M_pad - M), (0, 0)))
    grid_m = M_pad // tm

    flops = 2 * M_pad * D * (2 * D)
    transcendentals = M_pad * (D + 1)      # sigmoid per feature + rsqrt per row

    if use_resident:
        needed = (w_bytes * (1 if single_buffer else 2) + 2 * small_bytes
                  + 2 * tm * D * x_itemsize + 2 * tm * D * out_itemsize
                  + 10 * tm * D * 4)
        vmem_limit = min(vmem_budget, max(32 << 20, int(needed * 2)))
        cost = pl.CostEstimate(
            flops=flops, transcendentals=transcendentals,
            bytes_accessed=(M_pad * D * (x_itemsize + out_itemsize)
                            + w_bytes + small_bytes))
        out = pl.pallas_call(
            _gated_mlp_resident_kernel,
            out_shape=jax.ShapeDtypeStruct((M_pad, D), x.dtype),
            grid_spec=pltpu.PrefetchScalarGridSpec(
                num_scalar_prefetch=0,
                grid=(grid_m,),
                in_specs=[
                    pl.BlockSpec((tm, D), lambda i: (i, 0)),          # x tile
                    _resident_spec((D, 2 * D), lambda i: (0, 0), single_buffer),
                    _resident_spec((1, 2 * D), lambda i: (0, 0), single_buffer),
                    _resident_spec((2, D), lambda i: (0, 0), single_buffer),
                ],
                out_specs=pl.BlockSpec((tm, D), lambda i: (i, 0)),
            ),
            compiler_params=pltpu.CompilerParams(
                dimension_semantics=("parallel",),
                vmem_limit_bytes=vmem_limit),
            cost_estimate=cost,
        )(x2d, w_fused, b_fused, ln_params)
    else:
        nk = D // tk
        needed = (w_stream_bytes + 2 * small_bytes
                  + 2 * tm * tk * x_itemsize + 2 * tm * D * out_itemsize
                  + tm * (2 * D) * 4 + tm * D * x_itemsize
                  + 8 * tm * D * 4)
        vmem_limit = min(vmem_budget, max(32 << 20, int(needed * 2)))
        cost = pl.CostEstimate(
            flops=flops, transcendentals=transcendentals,
            bytes_accessed=(M_pad * D * (x_itemsize + out_itemsize)
                            + grid_m * D * (2 * D) * w_itemsize + small_bytes))
        out = pl.pallas_call(
            _gated_mlp_streamk_kernel,
            out_shape=jax.ShapeDtypeStruct((M_pad, D), x.dtype),
            grid_spec=pltpu.PrefetchScalarGridSpec(
                num_scalar_prefetch=0,
                grid=(grid_m, nk),
                in_specs=[
                    pl.BlockSpec((tm, tk), lambda i, k: (i, k)),      # x chunk
                    pl.BlockSpec((tk, 2 * D), lambda i, k: (k, 0)),   # W slab
                    _resident_spec((1, 2 * D), lambda i, k: (0, 0), single_buffer),
                    _resident_spec((2, D), lambda i, k: (0, 0), single_buffer),
                ],
                out_specs=pl.BlockSpec((tm, D), lambda i, k: (i, 0)),
                scratch_shapes=[
                    pltpu.VMEM((tm, 2 * D), jnp.float32),   # f32 accumulator
                    pltpu.VMEM((tm, D), x.dtype),           # x stash for residual
                ],
            ),
            compiler_params=pltpu.CompilerParams(
                dimension_semantics=("parallel", "arbitrary"),
                vmem_limit_bytes=vmem_limit),
            cost_estimate=cost,
        )(x2d, w_fused, b_fused, ln_params)

    if M_pad != M:
        out = out[:M]
    return out.reshape(B, S, D)


# --------------------------------------------------------------------------
# Reference + test
# --------------------------------------------------------------------------

def reference(x, w_gate, b_gate, gamma, beta):
    gates = jnp.einsum("bsd,ed->bse", x, w_gate) + b_gate
    D = x.shape[-1]
    ga, gb = gates[..., :D], gates[..., D:]
    h = ga * jax.nn.sigmoid(gb) + x
    mean = jnp.mean(h, axis=-1, keepdims=True)
    var = jnp.mean((h - mean) ** 2, axis=-1, keepdims=True)
    return (h - mean) / jnp.sqrt(var + _LN_EPS) * gamma + beta


if __name__ == "__main__":
    root = jax.random.PRNGKey(0)

    def make_inputs(D, B=2, S=8):
        kx, kw, kb = jax.random.split(jax.random.fold_in(root, D), 3)
        x = jax.random.normal(kx, (B, S, D), dtype=jnp.float32)
        # PyTorch nn.Linear(D, 2D): weight [2D, D], bias [2D]
        w_gate = jax.random.normal(kw, (2 * D, D), jnp.float32) * (1.0 / D) ** 0.5
        b_gate = jax.random.normal(kb, (2 * D,), jnp.float32) * 0.01
        gamma = jnp.ones((D,), jnp.float32)
        beta = jnp.zeros((D,), jnp.float32)
        return x, w_gate, b_gate, gamma, beta

    # 1) f32 resident-weight path (single fused matmul).
    x, w_gate, b_gate, gamma, beta = make_inputs(128)
    wf, bfu, ln = prepare_gated_mlp_params(w_gate, b_gate, gamma, beta)
    y = gated_mlp_block(x, wf, bfu, ln)
    jax.block_until_ready(y)
    y_ref = reference(x, w_gate, b_gate, gamma, beta)
    assert jnp.allclose(y, y_ref, atol=1e-2, rtol=1e-2), "f32 resident path mismatch"

    # 2) bf16 MXU-operand path (weights bf16, f32 accumulate + f32 epilogue).
    wf16, bfu16, ln16 = prepare_gated_mlp_params(
        w_gate, b_gate, gamma, beta, mxu_dtype=jnp.bfloat16)
    y16 = gated_mlp_block(x, wf16, bfu16, ln16)
    jax.block_until_ready(y16)
    assert jnp.allclose(y16, y_ref, atol=5e-2, rtol=5e-2), "bf16 path mismatch"

    # 3) Streaming-K path (forced on a small shape to exercise the large-D code).
    x2, w2, b2, g2, be2 = make_inputs(256)
    wf2, bfu2, ln2 = prepare_gated_mlp_params(w2, b2, g2, be2)
    y2 = gated_mlp_block(x2, wf2, bfu2, ln2, tk=128, max_resident_weight_bytes=0)
    jax.block_until_ready(y2)
    y2_ref = reference(x2, w2, b2, g2, be2)
    assert jnp.allclose(y2, y2_ref, atol=1e-2, rtol=1e-2), "streaming-K path mismatch"

    print("KERNEL_OK")
</pallas_src>

<mosaic_0001>
module attributes {stable_mosaic.version = 11 : i64} {
  func.func @_gated_mlp_resident_kernel(%arg0: i32, %arg1: memref<16x128xf32, #tpu.memory_space<vmem>>, %arg2: memref<128x256xf32, #tpu.memory_space<vmem>>, %arg3: memref<1x256xf32, #tpu.memory_space<vmem>>, %arg4: memref<2x128xf32, #tpu.memory_space<vmem>>, %arg5: memref<16x128xf32, #tpu.memory_space<vmem>>) attributes {dimension_semantics = [#tpu.dimension_semantics<parallel>], iteration_bounds = array<i64: 1>, scalar_prefetch = 0 : i64, scratch_operands = 0 : i64, tpu.core_type = #tpu.core_type<tc>, window_params = [{transform_indices = @transform_0, window_bounds = array<i64: 16, 128>}, {pipeline_mode = #tpu.pipeline_mode<synchronous>, transform_indices = @transform_1, window_bounds = array<i64: 128, 256>}, {pipeline_mode = #tpu.pipeline_mode<synchronous>, transform_indices = @transform_2, window_bounds = array<i64: 1, 256>}, {pipeline_mode = #tpu.pipeline_mode<synchronous>, transform_indices = @transform_3, window_bounds = array<i64: 2, 128>}, {transform_indices = @transform_4, window_bounds = array<i64: 16, 128>}]} {
    %c0 = arith.constant 0 : index
    %c0_0 = arith.constant 0 : index
    %0 = vector.load %arg1[%c0, %c0_0] : memref<16x128xf32, #tpu.memory_space<vmem>>, vector<16x128xf32>
    %c0_1 = arith.constant 0 : index
    %c0_2 = arith.constant 0 : index
    %1 = vector.load %arg2[%c0_1, %c0_2] : memref<128x256xf32, #tpu.memory_space<vmem>>, vector<128x256xf32>
    %cst = arith.constant dense<0.000000e+00> : vector<16x256xf32>
    %2 = tpu.matmul %0, %1, %cst {dimension_numbers = #tpu.dot_dimension_numbers<[1], [0], [0], [1], [0, 0, 1, 1], [], []>} : vector<16x128xf32>, vector<128x256xf32>, vector<16x256xf32> -> vector<16x256xf32>
    %c0_3 = arith.constant 0 : index
    %c0_4 = arith.constant 0 : index
    %3 = vector.load %arg3[%c0_3, %c0_4] : memref<1x256xf32, #tpu.memory_space<vmem>>, vector<1x256xf32>
    %4 = vector.broadcast %3 : vector<1x256xf32> to vector<16x256xf32>
    %5 = arith.addf %2, %4 : vector<16x256xf32>
    %6 = vector.extract_strided_slice %5 {offsets = [0, 0], sizes = [16, 128], strides = [1, 1]} : vector<16x256xf32> to vector<16x128xf32>
    %7 = vector.extract_strided_slice %5 {offsets = [0, 128], sizes = [16, 128], strides = [1, 1]} : vector<16x256xf32> to vector<16x128xf32>
    %8 = arith.negf %7 : vector<16x128xf32>
    %9 = math.exp %8 : vector<16x128xf32>
    %cst_5 = arith.constant 1.000000e+00 : f32
    %10 = vector.broadcast %cst_5 : f32 to vector<16x128xf32>
    %11 = arith.addf %10, %9 : vector<16x128xf32>
    %12 = arith.divf %10, %11 : vector<16x128xf32>
    %13 = arith.mulf %6, %12 : vector<16x128xf32>
    %14 = arith.addf %13, %0 : vector<16x128xf32>
    %cst_6 = arith.constant dense<0.000000e+00> : vector<16xf32>
    %15 = vector.multi_reduction <add>, %14, %cst_6 [1] : vector<16x128xf32> to vector<16xf32>
    %16 = vector.shape_cast %15 : vector<16xf32> to vector<16x1xf32>
    %cst_7 = arith.constant 7.812500e-03 : f32
    %17 = vector.broadcast %cst_7 : f32 to vector<16x1xf32>
    %18 = arith.mulf %16, %17 : vector<16x1xf32>
    %19 = arith.mulf %14, %14 : vector<16x128xf32>
    %cst_8 = arith.constant dense<0.000000e+00> : vector<16xf32>
    %20 = vector.multi_reduction <add>, %19, %cst_8 [1] : vector<16x128xf32> to vector<16xf32>
    %21 = vector.shape_cast %20 : vector<16xf32> to vector<16x1xf32>
    %cst_9 = arith.constant 7.812500e-03 : f32
    %22 = vector.broadcast %cst_9 : f32 to vector<16x1xf32>
    %23 = arith.mulf %21, %22 : vector<16x1xf32>
    %24 = arith.mulf %18, %18 : vector<16x1xf32>
    %25 = arith.subf %23, %24 : vector<16x1xf32>
    %26 = vector.broadcast %18 : vector<16x1xf32> to vector<16x128xf32>
    %27 = arith.subf %14, %26 : vector<16x128xf32>
    %cst_10 = arith.constant 9.99999974E-6 : f32
    %28 = vector.broadcast %cst_10 : f32 to vector<16x1xf32>
    %29 = arith.addf %25, %28 : vector<16x1xf32>
    %30 = math.rsqrt %29 : vector<16x1xf32>
    %31 = vector.broadcast %30 : vector<16x1xf32> to vector<16x128xf32>
    %32 = arith.mulf %27, %31 : vector<16x128xf32>
    %c0_11 = arith.constant 0 : index
    %c0_12 = arith.constant 0 : index
    %33 = vector.load %arg4[%c0_11, %c0_12] : memref<2x128xf32, #tpu.memory_space<vmem>>, vector<1x128xf32>
    %34 = vector.broadcast %33 : vector<1x128xf32> to vector<16x128xf32>
    %35 = arith.mulf %32, %34 : vector<16x128xf32>
    %c1 = arith.constant 1 : index
    %c0_13 = arith.constant 0 : index
    %36 = vector.load %arg4[%c1, %c0_13] : memref<2x128xf32, #tpu.memory_space<vmem>>, vector<1x128xf32>
    %37 = vector.broadcast %36 : vector<1x128xf32> to vector<16x128xf32>
    %38 = arith.addf %35, %37 : vector<16x128xf32>
    %c0_14 = arith.constant 0 : index
    %c0_15 = arith.constant 0 : index
    %39 = vector.load %arg5[%c0_14, %c0_15] : memref<16x128xf32, #tpu.memory_space<vmem>>, vector<16x128xf32>
    tpu.vector_store %arg5[%c0_14, %c0_15], %38 {strides = array<i32>} : memref<16x128xf32, #tpu.memory_space<vmem>>, vector<16x128xf32>,
    return
  }
  func.func @transform_0(%arg0: i32) -> (i32, i32) {
    %c0_i32 = arith.constant 0 : i32
    %c0_i32_0 = arith.constant 0 : i32
    return %arg0, %c0_i32 : i32, i32
  }
  func.func @transform_1(%arg0: i32) -> (i32, i32) {
    %c0_i32 = arith.constant 0 : i32
    %c0_i32_0 = arith.constant 0 : i32
    %c0_i32_1 = arith.constant 0 : i32
    return %c0_i32, %c0_i32_0 : i32, i32
  }
  func.func @transform_2(%arg0: i32) -> (i32, i32) {
    %c0_i32 = arith.constant 0 : i32
    %c0_i32_0 = arith.constant 0 : i32
    %c0_i32_1 = arith.constant 0 : i32
    return %c0_i32, %c0_i32_0 : i32, i32
  }
  func.func @transform_3(%arg0: i32) -> (i32, i32) {
    %c0_i32 = arith.constant 0 : i32
    %c0_i32_0 = arith.constant 0 : i32
    %c0_i32_1 = arith.constant 0 : i32
    return %c0_i32, %c0_i32_0 : i32, i32
  }
  func.func @transform_4(%arg0: i32) -> (i32, i32) {
    %c0_i32 = arith.constant 0 : i32
    %c0_i32_0 = arith.constant 0 : i32
    return %arg0, %c0_i32 : i32, i32
  }
}

</mosaic_0001>

<bundles_post_ra>
// kernel: gated_mlp_block.1
= control target key start
LH: loop header
LB: loop body
LE: loop exit
PB: predicated region body
PF: predicated region fallthrough
CT: control target
= control target key end

     0   :  { %9 = vsyncpa [#allocation3], 0  ;;  %s473_s0 = inlined_call_operand.hbm [shape: f32[16,128], index: 0, kind: input, shape index: {}]   ;;  %s474_s1 = inlined_call_operand.hbm [shape: f32[128,256], index: 1, kind: input, shape index: {}]   ;;  %s475_s2 = inlined_call_operand.vmem [shape: f32[1,256], index: 2, kind: input, shape index: {}]   ;;  %s476_s3 = inlined_call_operand.vmem [shape: f32[2,128], index: 3, kind: input, shape index: {}]   ;;  %s477_s4 = inlined_call_operand.hbm [shape: f32[16,128], index: 4, kind: output, shape index: {}]  }
   0x1   :  { %10 = vsyncpa [#allocation6], 0 }
   0x2   :  { %11 = vsyncpa [#allocation4], 0  ;;  %s389_s15 = smov [#allocation2]   ;;  %s317_s19 = scalar_lea.hbm %s473_s0, 256 }
   0x3   :  { %s17_s16 = sshll.u32 %s389_s15, 4  ;;  %p318_p0 = scmp.ne.s32.totalorder %s473_s0, %s317_s19  ;;  %s18_s16 = int_to_ptr.vmem [resolvable:$true] %s17_s16 }
   0x4   :  { %p321_p1 = scmp.lt.u32.totalorder %s317_s19, %s473_s0 }
   0x6   :  { %p323_p2 = pnand %p321_p1, %p318_p0 }
   0x8   :  { %326 = shalt.err (!%p323_p2)
}
   0x9   :  { %s327_s24 = scalar_lea.vmem %s18_s16, 256  ;;  %p332_p4 = scmp.lt.s32.totalorder %s18_s16, %s18_s16 }
   0xa   :  { %p328_p3 = scmp.ne.s32.totalorder %s18_s16, %s327_s24  ;;  %p333_p5 = scmp.lt.s32.totalorder %s327_s24, %s327_s24 }
   0xc   :  { %p334_p6 = por %p333_p5, %p332_p4 }
   0xe   :  { %p335_p7 = pnand %p334_p6, %p328_p3 }
  0x10   :  { %338 = shalt.err (!%p335_p7)
}
  0x11   :  { %s390_s25 = smov 128   ;;  %s391_s26 = smov 8  }
  0x12   :  { %23 = dma.hbm_to_vmem [thread:$0]  %s473_s0, 256, %s18_s16, [#allocation3], %s390_s25, %s390_s25, %s391_s26  }
  0x13   :  { %s392_s29 = smov [#allocation5]   ;;  %s339_s7 = scalar_lea.hbm %s474_s1, 4096 }
  0x14   :  { %s29_s30 = sshll.u32 %s392_s29, 4  ;;  %p340_p8 = scmp.ne.s32.totalorder %s474_s1, %s339_s7  ;;  %s30_s30 = int_to_ptr.vmem [resolvable:$true] %s29_s30 }
  0x15   :  { %p343_p9 = scmp.lt.u32.totalorder %s339_s7, %s474_s1 }
  0x17   :  { %p345_p10 = pnand %p343_p9, %p340_p8 }
  0x19   :  { %348 = shalt.err (!%p345_p10)
}
  0x1a   :  { %s349_s12 = scalar_lea.vmem %s30_s30, 4096  ;;  %p354_p12 = scmp.lt.s32.totalorder %s30_s30, %s30_s30 }
  0x1b   :  { %p350_p11 = scmp.ne.s32.totalorder %s30_s30, %s349_s12  ;;  %p355_p13 = scmp.lt.s32.totalorder %s349_s12, %s349_s12 }
  0x1d   :  { %p356_p0 = por %p355_p13, %p354_p12 }
  0x1f   :  { %p357_p1 = pnand %p356_p0, %p350_p11 }
  0x21   :  { %360 = shalt.err (!%p357_p1)
}
  0x22   :  { %s393_s0 = smov 256   ;;  %s394_s13 = smov 16  }
  0x23   :  { %35 = dma.hbm_to_vmem [thread:$0]  %s474_s1, 4096, %s30_s30, [#allocation6], %s393_s0, %s393_s0, %s394_s13  }
  0x24   :  { %383 = dma.done.wait [#allocation3], 256  }
  0x25   :  { %384 = vsyncadd [#allocation3], 4294967040 }
  0x26   :  { %385 = dma.done.wait [#allocation6], 4096  }
  0x27   :  { %386 = vsyncadd [#allocation6], 4294963200  ;;  %v395_v0 = vmov 0.0   ;;  %v49_v1 = vld [vmem:[#allocation5 + $0x8] sm:$0xff]  ;;  %v51_v2 = vld [vmem:[#allocation5 + $0x18] sm:$0xff]  ;;  %v82_v51 = vlaneseq  ;;  %s396_s20 = smov [#allocation7]  }
  0x28   :  { %156 = vmatprep.mubr.f32.mxu0 %v395_v0  ;;  %162 = vmatprep.mubr.f32.mxu1 %v395_v0  ;;  %v48_v3 = vld [vmem:[#allocation5] sm:$0xff]  ;;  %v249_v4 = vpack.c.bf16 %v51_v2, %v49_v1  ;;  %v50_v5 = vld [vmem:[#allocation5 + $0x10] sm:$0xff]  ;;  %v53_v6 = vld [vmem:[#allocation5 + $0x28] sm:$0xff]  ;;  %s232_s21 = sshll.u32 %s396_s20, 4  ;;  %s233_s21 = int_to_ptr.vmem [resolvable:$true] %s232_s21 }
  0x29   :  { %v55_v7 = vld [vmem:[#allocation5 + $0x38] sm:$0xff]  ;;  %v251_v8 = vpack.c.bf16 %v50_v5, %v48_v3  ;;  %v52_v10 = vld [vmem:[#allocation5 + $0x20] sm:$0xff]  ;;  %v54_v11 = vld [vmem:[#allocation5 + $0x30] sm:$0xff]  ;;  %v83_v52 = vshrl.u32 %v82_v51, 7  ;;  %s361_s22 = scalar_lea.vmem %s233_s21, 256  ;;  %p366_p3 = scmp.lt.s32.totalorder %s233_s21, %s233_s21 }
  0x2a   :  { %v253_v9 = vpack.c.bf16 %v55_v7, %v53_v6  ;;  %v57_v12 = vld [vmem:[#allocation5 + $0x48] sm:$0xff]  ;;  %250 = vmatprep.subr.bf16.mxu0 %v249_v4  ;;  %281 = vmatprep.subr.bf16.mxu1 %v249_v4  ;;  %v59_v13 = vld [vmem:[#allocation5 + $0x58] sm:$0xff]  ;;  %v255_v14 = vpack.c.bf16 %v54_v11, %v52_v10  ;;  %v56_v16 = vld [vmem:[#allocation5 + $0x40] sm:$0xff]  ;;  %p362_p2 = scmp.ne.s32.totalorder %s233_s21, %s361_s22  ;;  %p367_p4 = scmp.lt.s32.totalorder %s361_s22, %s361_s22 }
  0x2b   :  { %252 = vmatpush1.bf16.msra.mxu0 %v251_v8  ;;  %289 = vmatpush1.bf16.msra.mxu1 %v251_v8  ;;  %v257_v15 = vpack.c.bf16 %v59_v13, %v57_v12  ;;  %v58_v17 = vld [vmem:[#allocation5 + $0x50] sm:$0xff]  ;;  %v61_v18 = vld [vmem:[#allocation5 + $0x68] sm:$0xff]  ;;  %v63_v19 = vld [vmem:[#allocation5 + $0x78] sm:$0xff]  ;;  %v88_v53 = vsub.s32 1, %v83_v52  ;;  %v84_v4 = vsub.s32 0, %v83_v52 }
  0x2c   :  { %254 = vmatprep.subr.bf16.mxu0 %v253_v9  ;;  %282 = vmatprep.subr.bf16.mxu1 %v253_v9  ;;  %v259_v20 = vpack.c.bf16 %v58_v17, %v56_v16  ;;  %v261_v21 = vpack.c.bf16 %v63_v19, %v61_v18  ;;  %v60_v22 = vld [vmem:[#allocation5 + $0x60] sm:$0xff]  ;;  %v62_v23 = vld [vmem:[#allocation5 + $0x70] sm:$0xff]  ;;  %v65_v24 = vld [vmem:[#allocation5 + $0x88] sm:$0xff]  ;;  %p368_p5 = por %p367_p4, %p366_p3 }
  0x2d   :  { %v67_v25 = vld [vmem:[#allocation5 + $0x98] sm:$0xff]  ;;  %v263_v26 = vpack.c.bf16 %v62_v23, %v60_v22  ;;  %v64_v28 = vld [vmem:[#allocation5 + $0x80] sm:$0xff]  ;;  %v66_v29 = vld [vmem:[#allocation5 + $0x90] sm:$0xff] }
  0x2e   :  { %v265_v27 = vpack.c.bf16 %v67_v25, %v65_v24  ;;  %v69_v30 = vld [vmem:[#allocation5 + $0xa8] sm:$0xff]  ;;  %v71_v31 = vld [vmem:[#allocation5 + $0xb8] sm:$0xff]  ;;  %v267_v32 = vpack.c.bf16 %v66_v29, %v64_v28  ;;  %v68_v34 = vld [vmem:[#allocation5 + $0xa0] sm:$0xff]  ;;  %p369_p6 = pnand %p368_p5, %p362_p2 }
  0x2f   :  { %256 = vmatpush1.bf16.msra.mxu0 %v255_v14  ;;  %290 = vmatpush1.bf16.msra.mxu1 %v255_v14  ;;  %v269_v33 = vpack.c.bf16 %v71_v31, %v69_v30  ;;  %v70_v35 = vld [vmem:[#allocation5 + $0xb0] sm:$0xff]  ;;  %v73_v36 = vld [vmem:[#allocation5 + $0xc8] sm:$0xff]  ;;  %v75_v37 = vld [vmem:[#allocation5 + $0xd8] sm:$0xff] }
  0x30   :  { %258 = vmatprep.subr.bf16.mxu0 %v257_v15  ;;  %283 = vmatprep.subr.bf16.mxu1 %v257_v15  ;;  %v271_v38 = vpack.c.bf16 %v70_v35, %v68_v34  ;;  %v273_v39 = vpack.c.bf16 %v75_v37, %v73_v36  ;;  %v72_v40 = vld [vmem:[#allocation5 + $0xc0] sm:$0xff]  ;;  %v74_v41 = vld [vmem:[#allocation5 + $0xd0] sm:$0xff]  ;;  %v77_v42 = vld [vmem:[#allocation5 + $0xe8] sm:$0xff] }
  0x31   :  { %v79_v43 = vld [vmem:[#allocation5 + $0xf8] sm:$0xff]  ;;  %v275_v44 = vpack.c.bf16 %v74_v41, %v72_v40  ;;  %v76_v46 = vld [vmem:[#allocation5 + $0xe0] sm:$0xff]  ;;  %v78_v47 = vld [vmem:[#allocation5 + $0xf0] sm:$0xff] }
  0x32   :  { %v277_v45 = vpack.c.bf16 %v79_v43, %v77_v42  ;;  %v279_v48 = vpack.c.bf16 %v78_v47, %v76_v46  ;;  %v46_v49 = vld [vmem:[#allocation2] sm:$0xff]  ;;  %v47_v50 = vld [vmem:[#allocation2 + $0x8] sm:$0xff] }
  0x33   :  { %260 = vmatpush1.bf16.msra.mxu0 %v259_v20  ;;  %291 = vmatpush1.bf16.msra.mxu1 %v259_v20  ;;  %v80_v54 = vld [vmem:[%s475_s2] sm:$0x3] }
  0x34   :  { %262 = vmatprep.subr.bf16.mxu0 %v261_v21  ;;  %284 = vmatprep.subr.bf16.mxu1 %v261_v21  ;;  %v89_v55 = vrot.slane %v80_v54, %v88_v53  ;;  %v85_v5 = vrot.slane %v80_v54, %v84_v4  ;;  %v248_v34 = vld [vmem:[%s476_s3 + $0x1] ss:$0 sm:$0xff] }
  0x37   :  { %264 = vmatpush1.bf16.msra.mxu0 %v263_v26  ;;  %292 = vmatpush1.bf16.msra.mxu1 %v263_v26 }
  0x38   :  { %266 = vmatprep.subr.bf16.mxu0 %v265_v27  ;;  %285 = vmatprep.subr.bf16.mxu1 %v265_v27 }
  0x3b   :  { %268 = vmatpush1.bf16.msra.mxu0 %v267_v32  ;;  %293 = vmatpush1.bf16.msra.mxu1 %v267_v32  ;;  %v247_v32 = vld [vmem:[%s476_s3] ss:$0 sm:$0xff] }
  0x3c   :  { %270 = vmatprep.subr.bf16.mxu0 %v269_v33  ;;  %286 = vmatprep.subr.bf16.mxu1 %v269_v33 }
  0x3f   :  { %272 = vmatpush1.bf16.msra.mxu0 %v271_v38  ;;  %294 = vmatpush1.bf16.msra.mxu1 %v271_v38 }
  0x40   :  { %274 = vmatprep.subr.bf16.mxu0 %v273_v39  ;;  %287 = vmatprep.subr.bf16.mxu1 %v273_v39 }
  0x43   :  { %276 = vmatpush1.bf16.msra.mxu0 %v275_v44  ;;  %295 = vmatpush1.bf16.msra.mxu1 %v275_v44 }
  0x44   :  { %278 = vmatprep.subr.bf16.mxu0 %v277_v45  ;;  %288 = vmatprep.subr.bf16.mxu1 %v277_v45 }
  0x47   :  { %280 = vmatpush1.bf16.msra.mxu0 %v279_v48  ;;  %296 = vmatpush1.bf16.msra.mxu1 %v279_v48 }
  0x4a   :  { %157 = vmatmul.mubr.f32.vlgmr.msra.gmra.mrb[0].mxu0 %v46_v49  ;;  %163 = vmatmul.mubr.f32.vlgmr.msra.gmra.mrb[0].mxu1 %v47_v50 }
 0x11d   :  { %v158_v56 = vpop.f32.mrb[0].mxu0  ;;  %v164_v57 = vpop.f32.mrb[0].mxu1 }
 0x11e   :  { %v160_v58 = vpop.f32.mrb[1].mxu0  ;;  %v166_v59 = vpop.f32.mrb[1].mxu1  ;;  %v159_v6 = vadd.f32 %v158_v56, %v85_v5  ;;  %v165_v8 = vadd.f32 %v164_v57, %v85_v5 }
 0x11f   :  { %v161_v60 = vadd.f32 %v160_v58, %v89_v55  ;;  %v167_v61 = vadd.f32 %v166_v59, %v89_v55 }
 0x121   :  { %v245_v62 = vmul.f32 -1.442695, %v161_v60  ;;  %v246_v63 = vmul.f32 -1.442695, %v167_v61 }
 0x123   :  { %305 = vpow2.f32 %v245_v62 }
 0x124   :  { %307 = vpow2.f32 %v246_v63 }
 0x12d   :  { %v306_v0 = vpop.eup %305 }
 0x12e   :  { %v308_v1 = vpop.eup %307  ;;  %v175_v2 = vadd.f32 1.0, %v306_v0 }
 0x12f   :  { %v176_v3 = vadd.f32 1.0, %v308_v1 }
 0x130   :  { %309 = vrcp.f32 %v175_v2 }
 0x131   :  { %311 = vrcp.f32 %v176_v3 }
 0x13a   :  { %v310_v7 = vpop.eup %309 }
 0x13b   :  { %v312_v9 = vpop.eup %311  ;;  %v181_v10 = vmul.f32 %v310_v7, %v159_v6 }
 0x13c   :  { %v182_v11 = vmul.f32 %v312_v9, %v165_v8 }
 0x13d   :  { %v183_v12 = vadd.f32 %v181_v10, %v46_v49 }
 0x13e   :  { %v184_v14 = vadd.f32 %v182_v11, %v47_v50 }
 0x13f   :  { %185 = vadd.xlane.f32.xlu0 %v183_v12  ;;  %v191_v13 = vmul.f32 %v183_v12, %v183_v12 }
 0x140   :  { %v192_v15 = vmul.f32 %v184_v14, %v184_v14 }
 0x141   :  { %193 = vadd.xlane.f32.xlu1 %v191_v13 }
 0x143   :  { %187 = vadd.xlane.f32.xlu0 %v184_v14 }
 0x145   :  { %195 = vadd.xlane.f32.xlu1 %v192_v15 }
 0x1cc   :  { %v186_v16 = vpop.xlane.xlu0 %185 }
 0x1cd   :  { %v189_v17 = vmul.f32 0.0078125, %v186_v16 }
 0x1ce   :  { %v194_v18 = vpop.xlane.xlu1 %193 }
 0x1cf   :  { %v199_v19 = vmul.f32 %v189_v17, %v189_v17  ;;  %v197_v20 = vmul.f32 0.0078125, %v194_v18  ;;  %v203_v30 = vsub.f32 %v183_v12, %v189_v17 }
 0x1d0   :  { %v188_v21 = vpop.xlane.xlu0 %187 }
 0x1d1   :  { %v201_v22 = vsub.f32 %v197_v20, %v199_v19  ;;  %v190_v23 = vmul.f32 0.0078125, %v188_v21 }
 0x1d2   :  { %v196_v24 = vpop.xlane.xlu1 %195 }
 0x1d3   :  { %v205_v25 = vadd.f32 1e-05, %v201_v22  ;;  %v200_v26 = vmul.f32 %v190_v23, %v190_v23  ;;  %v198_v27 = vmul.f32 0.0078125, %v196_v24  ;;  %v204_v35 = vsub.f32 %v184_v14, %v190_v23 }
 0x1d5   :  { %313 = vrsqrt.f32 %v205_v25  ;;  %v202_v28 = vsub.f32 %v198_v27, %v200_v26 }
 0x1d7   :  { %v206_v29 = vadd.f32 1e-05, %v202_v28 }
 0x1d9   :  { %315 = vrsqrt.f32 %v206_v29 }
 0x1df   :  { %v314_v31 = vpop.eup %313 }
 0x1e0   :  { %v209_v33 = vmul.f32 %v314_v31, %v203_v30 }
 0x1e2   :  { %v216_v36 = vmul.f32 %v247_v32, %v209_v33 }
 0x1e3   :  { %v316_v37 = vpop.eup %315 }
 0x1e4   :  { %v210_v38 = vmul.f32 %v316_v37, %v204_v35  ;;  %v223_v39 = vadd.f32 %v248_v34, %v216_v36 }
 0x1e6   :  { %v217_v40 = vmul.f32 %v247_v32, %v210_v38  ;;  %225 = vst [vmem:[#allocation7] sm:$0xff] %v223_v39 }
 0x1e8   :  { %v224_v41 = vadd.f32 %v248_v34, %v217_v40 }
 0x1ea   :  { %226 = vst [vmem:[#allocation7 + $0x8] sm:$0xff] %v224_v41 }
 0x1eb   :  { %372 = shalt.err (!%p369_p6)
}
 0x1ec   :  { %s373_s24 = scalar_lea.hbm %s477_s4, 256 }
 0x1ed   :  { %p374_p7 = scmp.ne.s32.totalorder %s477_s4, %s373_s24  ;;  %p377_p8 = scmp.lt.u32.totalorder %s373_s24, %s477_s4 }
 0x1ef   :  { %p379_p9 = pnand %p377_p8, %p374_p7 }
 0x1f1   :  { %382 = shalt.err (!%p379_p9)
}
 0x1f2   :  { %238 = dma.vmem_to_hbm [thread:$0]  %s233_s21, 256, %s477_s4, [#allocation4], %s390_s25, %s390_s25, %s391_s26  }
 0x1f3   :  { %387 = dma.done.wait [#allocation4], 256  }
 0x1f4   :  { %388 = vsyncadd [#allocation4], 4294967040 }
 0x1f5   :  { %242 = vsyncpa [#allocation3], 1 }
 0x1f6   :  { %243 = vsyncpa [#allocation6], 1 }
 0x1f7   :  { %244 = vsyncpa [#allocation4], 1 }

</bundles_post_ra>
